<compile_context>
chip_gen: v5e
topology: v5e:2x2
jax: 0.10.0
libtpu: 0.0.40
codegen_flags: <defaults>
</compile_context>

<pallas_src>
import functools

import jax
import jax.numpy as jnp
from jax.experimental import pallas as pl
from jax.experimental.pallas import tpu as pltpu

EPS = 1e-5  # PyTorch InstanceNorm2d default


def _round_up(x, m):
    return (x + m - 1) // m * m


def _eye(n, dtype):
    # 2-D iota-based identity (safe to lower inside a Pallas TPU kernel).
    r = jax.lax.broadcasted_iota(jnp.int32, (n, n), 0)
    c = jax.lax.broadcasted_iota(jnp.int32, (n, n), 1)
    return (r == c).astype(dtype)


def _vmem_budget_bytes():
    # ~3/4 of physical VMEM: 96 MiB on v5e/v6e (128 MiB), 48 MiB on v7x (64 MiB).
    try:
        cap = int(pltpu.get_tpu_info().vmem_capacity_bytes)
    except Exception:
        cap = 64 * 1024 * 1024
    return (cap * 3) // 4


# ----------------------------------------------------------------------------
# Path A: fused single-block-per-batch kernel (stats + folded conv in one pass)
# ----------------------------------------------------------------------------
def _fused_kernel(x1_ref, x2_ref, g1_ref, b1_ref, g2_ref, b2_ref,
                  w1_ref, w2_ref, o_ref, *, inv_hw):
    # x1: (1, C1, HWp)  x2: (1, C2, HWp)  g*/b*: (C*, 1)  w*: (Cout, C*) f32
    # o : (1, Cout, HWp).  HWp is padded with zero lanes; inv_hw = 1/true_HW.
    x1 = x1_ref[0]                       # source dtype, HW on lanes
    x2 = x2_ref[0]
    x1f = x1.astype(jnp.float32)         # f32 only for the stats
    x2f = x2.astype(jnp.float32)

    def fold(xf, g_ref, b_ref, w_ref):
        # Per-channel InstanceNorm stats over the spatial (lane) axis.
        # Padded lanes are zeros so they contribute nothing to the sums.
        mean = jnp.sum(xf, axis=-1, keepdims=True) * inv_hw            # (C, 1)
        mean_sq = jnp.sum(xf * xf, axis=-1, keepdims=True) * inv_hw    # (C, 1)
        var = mean_sq - mean * mean                                    # biased
        scale = g_ref[...] * jax.lax.rsqrt(var + EPS)                  # (C, 1)
        shift = b_ref[...] - mean * scale                              # (C, 1)
        c = xf.shape[0]
        eye_c = _eye(c, jnp.float32)                                   # (C, C)
        w = w_ref[...]                                                 # (Cout, C)
        # Fold the affine into the conv: W' = W @ diag(scale); bias = W @ shift
        # (shift applied via diag + lane-reduce to stay transpose-free).
        w_folded = jnp.dot(w, scale * eye_c,
                           preferred_element_type=jnp.float32)         # (Cout, C)
        w_shift = jnp.dot(w, shift * eye_c,
                          preferred_element_type=jnp.float32)          # (Cout, C)
        bias = jnp.sum(w_shift, axis=-1, keepdims=True)                # (Cout, 1)
        return w_folded, bias

    w1p, bias1 = fold(x1f, g1_ref, b1_ref, w1_ref)
    w2p, bias2 = fold(x2f, g2_ref, b2_ref, w2_ref)

    # 1x1 conv on the *raw* activations (MXU consumes x in its source dtype).
    out = jnp.dot(w1p.astype(x1.dtype), x1, preferred_element_type=jnp.float32)
    out = out + jnp.dot(w2p.astype(x2.dtype), x2,
                        preferred_element_type=jnp.float32)
    out = out + (bias1 + bias2)
    o_ref[0] = out.astype(o_ref.dtype)


# ----------------------------------------------------------------------------
# Path B: HW-tiled two-pass (stats accumulation kernel + apply/conv kernel)
# ----------------------------------------------------------------------------
def _stats_kernel(x1_ref, x2_ref, s1_ref, q1_ref, s2_ref, q2_ref):
    # Accumulate per-channel sum / sum-of-squares across HW tiles.
    @pl.when(pl.program_id(1) == 0)
    def _():
        s1_ref[...] = jnp.zeros_like(s1_ref)
        q1_ref[...] = jnp.zeros_like(q1_ref)
        s2_ref[...] = jnp.zeros_like(s2_ref)
        q2_ref[...] = jnp.zeros_like(q2_ref)

    x1 = x1_ref[0].astype(jnp.float32)   # (C1, hw_tile)
    x2 = x2_ref[0].astype(jnp.float32)   # (C2, hw_tile)
    s1_ref[0] += jnp.sum(x1, axis=-1, keepdims=True)
    q1_ref[0] += jnp.sum(x1 * x1, axis=-1, keepdims=True)
    s2_ref[0] += jnp.sum(x2, axis=-1, keepdims=True)
    q2_ref[0] += jnp.sum(x2 * x2, axis=-1, keepdims=True)


def _apply_kernel(x1_ref, x2_ref, w1_ref, w2_ref, bias_ref, o_ref):
    # Pre-folded per-batch weights/bias; pure matmul + bias on each HW tile.
    x1 = x1_ref[0]                                   # (C1, hw_tile)
    x2 = x2_ref[0]                                   # (C2, hw_tile)
    out = jnp.dot(w1_ref[0], x1, preferred_element_type=jnp.float32)
    out = out + jnp.dot(w2_ref[0], x2, preferred_element_type=jnp.float32)
    out = out + bias_ref[0]                          # (Cout, 1) broadcast
    o_ref[0] = out.astype(o_ref.dtype)


# ----------------------------------------------------------------------------
# Wrapper
# ----------------------------------------------------------------------------
def combining_forward(first, second, gamma, beta, weight, *,
                      force_tiled=False, hw_tile=None):
    """first: (N,C1,H,W), second: (N,C2,H,W), gamma/beta: (C1+C2,),
    weight: (Cout, C1+C2).  Returns (N, Cout, H, W) in the input dtype."""
    n, c1, h, w = first.shape
    c2 = second.shape[1]
    c_out = weight.shape[0]
    hw = h * w
    dtype = first.dtype
    itemsize = jnp.dtype(dtype).itemsize

    # Free reshapes / slices only -- no concat, no layout transposes.
    x1 = first.reshape(n, c1, hw)
    x2 = second.reshape(n, c2, hw)
    g1 = gamma[:c1].reshape(c1, 1).astype(jnp.float32)
    g2 = gamma[c1:].reshape(c2, 1).astype(jnp.float32)
    b1 = beta[:c1].reshape(c1, 1).astype(jnp.float32)
    b2 = beta[c1:].reshape(c2, 1).astype(jnp.float32)
    w1f = weight[:, :c1].astype(jnp.float32)          # (Cout, C1)
    w2f = weight[:, c1:].astype(jnp.float32)          # (Cout, C2)

    budget = _vmem_budget_bytes()
    hw_lane = _round_up(hw, 128)
    # Double-buffered per-batch block + f32 stat temps + params + headroom.
    fused_footprint = (2 * (c1 + c2 + c_out) * hw_lane * itemsize
                       + (c1 + c2 + c_out) * hw_lane * 4
                       + 4 * (2 * (c1 + c2) + c_out * (c1 + c2))
                       + (2 << 20))
    use_tiled = force_tiled or (fused_footprint > budget)

    if not use_tiled:
        # ----- Path A: one lane-dense block per batch -----
        hw_pad = hw_lane
        if hw_pad != hw:
            pad = hw_pad - hw
            x1 = jnp.pad(x1, ((0, 0), (0, 0), (0, pad)))
            x2 = jnp.pad(x2, ((0, 0), (0, 0), (0, pad)))

        vmem_limit = int(min(budget, max(fused_footprint, 16 << 20)))
        out = pl.pallas_call(
            functools.partial(_fused_kernel, inv_hw=1.0 / hw),
            out_shape=jax.ShapeDtypeStruct((n, c_out, hw_pad), dtype),
            grid_spec=pltpu.PrefetchScalarGridSpec(
                num_scalar_prefetch=0,
                grid=(n,),
                in_specs=[
                    pl.BlockSpec((1, c1, hw_pad), lambda i: (i, 0, 0)),   # x1
                    pl.BlockSpec((1, c2, hw_pad), lambda i: (i, 0, 0)),   # x2
                    pl.BlockSpec((c1, 1), lambda i: (0, 0)),              # gamma1
                    pl.BlockSpec((c1, 1), lambda i: (0, 0)),              # beta1
                    pl.BlockSpec((c2, 1), lambda i: (0, 0)),              # gamma2
                    pl.BlockSpec((c2, 1), lambda i: (0, 0)),              # beta2
                    pl.BlockSpec((c_out, c1), lambda i: (0, 0)),          # w1
                    pl.BlockSpec((c_out, c2), lambda i: (0, 0)),          # w2
                ],
                out_specs=pl.BlockSpec((1, c_out, hw_pad), lambda i: (i, 0, 0)),
            ),
            compiler_params=pltpu.CompilerParams(
                dimension_semantics=("parallel",),
                vmem_limit_bytes=vmem_limit,
            ),
            cost_estimate=pl.CostEstimate(
                flops=2 * n * hw_pad * (c1 + c2) * c_out
                      + 4 * n * hw_pad * (c1 + c2),
                transcendentals=n * (c1 + c2),
                bytes_accessed=n * hw_pad * (c1 + c2 + c_out) * itemsize,
            ),
        )(x1, x2, g1, b1, g2, b2, w1f, w2f)
        if hw_pad != hw:
            out = out[:, :, :hw]
        return out.reshape(n, c_out, h, w)

    # ----- Path B: HW-tiled two-pass -----
    if hw_tile is None:
        hw_tile = min(2048, _round_up(hw, 128))
    hw_tile = _round_up(hw_tile, 128)
    hw_pad = _round_up(hw, hw_tile)
    t_steps = hw_pad // hw_tile
    if hw_pad != hw:
        pad = hw_pad - hw
        x1 = jnp.pad(x1, ((0, 0), (0, 0), (0, pad)))
        x2 = jnp.pad(x2, ((0, 0), (0, 0), (0, pad)))

    # Pass 1: per-(batch, channel) sum / sumsq accumulated over HW tiles.
    vmem_limit1 = int(min(budget,
                          max(4 * (c1 + c2) * hw_tile * itemsize + (4 << 20),
                              16 << 20)))
    s1, q1, s2, q2 = pl.pallas_call(
        _stats_kernel,
        out_shape=(
            jax.ShapeDtypeStruct((n, c1, 1), jnp.float32),
            jax.ShapeDtypeStruct((n, c1, 1), jnp.float32),
            jax.ShapeDtypeStruct((n, c2, 1), jnp.float32),
            jax.ShapeDtypeStruct((n, c2, 1), jnp.float32),
        ),
        grid_spec=pltpu.PrefetchScalarGridSpec(
            num_scalar_prefetch=0,
            grid=(n, t_steps),
            in_specs=[
                pl.BlockSpec((1, c1, hw_tile), lambda i, t: (i, 0, t)),
                pl.BlockSpec((1, c2, hw_tile), lambda i, t: (i, 0, t)),
            ],
            out_specs=[
                pl.BlockSpec((1, c1, 1), lambda i, t: (i, 0, 0)),
                pl.BlockSpec((1, c1, 1), lambda i, t: (i, 0, 0)),
                pl.BlockSpec((1, c2, 1), lambda i, t: (i, 0, 0)),
                pl.BlockSpec((1, c2, 1), lambda i, t: (i, 0, 0)),
            ],
        ),
        compiler_params=pltpu.CompilerParams(
            dimension_semantics=("parallel", "arbitrary"),
            vmem_limit_bytes=vmem_limit1,
        ),
        cost_estimate=pl.CostEstimate(
            flops=3 * n * hw_pad * (c1 + c2),
            transcendentals=0,
            bytes_accessed=n * hw_pad * (c1 + c2) * itemsize,
        ),
    )(x1, x2)

    # Tiny per-(batch, channel) math in plain JAX: fold InstanceNorm affine
    # into per-batch conv weights + bias (true H*W, padded lanes excluded).
    inv_hw = 1.0 / hw

    def fold(s, q, g, b, wslice):
        mean = s * inv_hw                                    # (n, c, 1)
        var = q * inv_hw - mean * mean
        scale = g[None] * jax.lax.rsqrt(var + EPS)           # (n, c, 1)
        shift = b[None] - mean * scale                       # (n, c, 1)
        wp = wslice[None, :, :] * jnp.squeeze(scale, -1)[:, None, :]  # (n,Cout,c)
        bias = jnp.einsum("oc,nck->nok", wslice, shift)      # (n, Cout, 1)
        return wp.astype(dtype), bias

    w1p, bias1 = fold(s1, q1, g1, b1, w1f)
    w2p, bias2 = fold(s2, q2, g2, b2, w2f)
    bias = (bias1 + bias2).astype(jnp.float32)

    # Pass 2: apply folded 1x1 conv per HW tile (fully parallel grid).
    vmem_limit2 = int(min(budget,
                          max(2 * (c1 + c2 + c_out) * hw_tile * itemsize
                              + (4 << 20), 16 << 20)))
    out = pl.pallas_call(
        _apply_kernel,
        out_shape=jax.ShapeDtypeStruct((n, c_out, hw_pad), dtype),
        grid_spec=pltpu.PrefetchScalarGridSpec(
            num_scalar_prefetch=0,
            grid=(n, t_steps),
            in_specs=[
                pl.BlockSpec((1, c1, hw_tile), lambda i, t: (i, 0, t)),   # x1
                pl.BlockSpec((1, c2, hw_tile), lambda i, t: (i, 0, t)),   # x2
                pl.BlockSpec((1, c_out, c1), lambda i, t: (i, 0, 0)),     # W1'
                pl.BlockSpec((1, c_out, c2), lambda i, t: (i, 0, 0)),     # W2'
                pl.BlockSpec((1, c_out, 1), lambda i, t: (i, 0, 0)),      # bias
            ],
            out_specs=pl.BlockSpec((1, c_out, hw_tile), lambda i, t: (i, 0, t)),
        ),
        compiler_params=pltpu.CompilerParams(
            dimension_semantics=("parallel", "parallel"),
            vmem_limit_bytes=vmem_limit2,
        ),
        cost_estimate=pl.CostEstimate(
            flops=2 * n * hw_pad * (c1 + c2) * c_out,
            transcendentals=0,
            bytes_accessed=n * hw_pad * (c1 + c2 + c_out) * itemsize,
        ),
    )(x1, x2, w1p, w2p, bias)
    if hw_pad != hw:
        out = out[:, :, :hw]
    return out.reshape(n, c_out, h, w)


# ----------------------------------------------------------------------------
# Pure-JAX reference (matches the PyTorch module)
# ----------------------------------------------------------------------------
def _reference(first, second, gamma, beta, weight):
    x = jnp.concatenate([first, second], axis=1)
    mean = jnp.mean(x, axis=(2, 3), keepdims=True)
    var = jnp.mean((x - mean) ** 2, axis=(2, 3), keepdims=True)
    y = (x - mean) * jax.lax.rsqrt(var + EPS)
    y = y * gamma[None, :, None, None] + beta[None, :, None, None]
    return jnp.einsum("oc,nchw->nohw", weight, y)


if __name__ == "__main__":
    key = jax.random.PRNGKey(0)
    k1, k2, k3, k4, k5 = jax.random.split(key, 5)

    first_num_filters = 4
    second_num_filters = 4
    output_num_filters = 8
    N, H, W = 2, 16, 16
    c_in = first_num_filters + second_num_filters

    first = jax.random.normal(k1, (N, first_num_filters, H, W), jnp.float32)
    second = jax.random.normal(k2, (N, second_num_filters, H, W), jnp.float32)
    gamma = 1.0 + 0.1 * jax.random.normal(k3, (c_in,), jnp.float32)
    beta = 0.1 * jax.random.normal(k4, (c_in,), jnp.float32)
    weight = 0.2 * jax.random.normal(k5, (output_num_filters, c_in), jnp.float32)

    ref = _reference(first, second, gamma, beta, weight)

    # Path A: fused single-block-per-batch kernel (auto-selected at this size).
    out = jax.block_until_ready(
        combining_forward(first, second, gamma, beta, weight))
    assert out.shape == (N, output_num_filters, H, W)
    assert jnp.allclose(out, ref, atol=1e-4, rtol=1e-4), float(
        jnp.max(jnp.abs(out - ref)))

    # Path B: HW-tiled two-pass kernel (used for large H*W / small-VMEM chips).
    out_tiled = jax.block_until_ready(
        combining_forward(first, second, gamma, beta, weight,
                          force_tiled=True, hw_tile=128))
    assert jnp.allclose(out_tiled, ref, atol=1e-4, rtol=1e-4), float(
        jnp.max(jnp.abs(out_tiled - ref)))

    # Non-multiple-of-128 spatial size exercises lane padding + masked stats.
    H2, W2 = 10, 10
    f2 = jax.random.normal(k1, (N, first_num_filters, H2, W2), jnp.float32)
    s2 = jax.random.normal(k2, (N, second_num_filters, H2, W2), jnp.float32)
    ref2 = _reference(f2, s2, gamma, beta, weight)
    out2 = jax.block_until_ready(
        combining_forward(f2, s2, gamma, beta, weight))
    assert jnp.allclose(out2, ref2, atol=1e-4, rtol=1e-4), float(
        jnp.max(jnp.abs(out2 - ref2)))

    print("KERNEL_OK")
</pallas_src>

<mosaic_0001>
module attributes {stable_mosaic.version = 11 : i64} {
  func.func @_fused_kernel(%arg0: i32, %arg1: memref<1x4x256xf32, #tpu.memory_space<vmem>>, %arg2: memref<1x4x256xf32, #tpu.memory_space<vmem>>, %arg3: memref<4x1xf32, #tpu.memory_space<vmem>>, %arg4: memref<4x1xf32, #tpu.memory_space<vmem>>, %arg5: memref<4x1xf32, #tpu.memory_space<vmem>>, %arg6: memref<4x1xf32, #tpu.memory_space<vmem>>, %arg7: memref<8x4xf32, #tpu.memory_space<vmem>>, %arg8: memref<8x4xf32, #tpu.memory_space<vmem>>, %arg9: memref<1x8x256xf32, #tpu.memory_space<vmem>>) attributes {dimension_semantics = [#tpu.dimension_semantics<parallel>], iteration_bounds = array<i64: 2>, scalar_prefetch = 0 : i64, scratch_operands = 0 : i64, tpu.core_type = #tpu.core_type<tc>, window_params = [{transform_indices = @transform_0, window_bounds = array<i64: 1, 4, 256>}, {transform_indices = @transform_1, window_bounds = array<i64: 1, 4, 256>}, {pipeline_mode = #tpu.pipeline_mode<synchronous>, transform_indices = @transform_2, window_bounds = array<i64: 4, 1>}, {pipeline_mode = #tpu.pipeline_mode<synchronous>, transform_indices = @transform_3, window_bounds = array<i64: 4, 1>}, {pipeline_mode = #tpu.pipeline_mode<synchronous>, transform_indices = @transform_4, window_bounds = array<i64: 4, 1>}, {pipeline_mode = #tpu.pipeline_mode<synchronous>, transform_indices = @transform_5, window_bounds = array<i64: 4, 1>}, {pipeline_mode = #tpu.pipeline_mode<synchronous>, transform_indices = @transform_6, window_bounds = array<i64: 8, 4>}, {pipeline_mode = #tpu.pipeline_mode<synchronous>, transform_indices = @transform_7, window_bounds = array<i64: 8, 4>}, {transform_indices = @transform_8, window_bounds = array<i64: 1, 8, 256>}]} {
    %c0 = arith.constant 0 : index
    %c0_0 = arith.constant 0 : index
    %c0_1 = arith.constant 0 : index
    %0 = vector.load %arg1[%c0, %c0_0, %c0_1] : memref<1x4x256xf32, #tpu.memory_space<vmem>>, vector<1x4x256xf32>
    %1 = vector.shape_cast %0 : vector<1x4x256xf32> to vector<4x256xf32>
    %c0_2 = arith.constant 0 : index
    %c0_3 = arith.constant 0 : index
    %c0_4 = arith.constant 0 : index
    %2 = vector.load %arg2[%c0_2, %c0_3, %c0_4] : memref<1x4x256xf32, #tpu.memory_space<vmem>>, vector<1x4x256xf32>
    %3 = vector.shape_cast %2 : vector<1x4x256xf32> to vector<4x256xf32>
    %cst = arith.constant dense<0.000000e+00> : vector<4xf32>
    %4 = vector.multi_reduction <add>, %1, %cst [1] : vector<4x256xf32> to vector<4xf32>
    %5 = vector.shape_cast %4 : vector<4xf32> to vector<4x1xf32>
    %cst_5 = arith.constant 3.906250e-03 : f32
    %6 = vector.broadcast %cst_5 : f32 to vector<4x1xf32>
    %7 = arith.mulf %5, %6 : vector<4x1xf32>
    %8 = arith.mulf %1, %1 : vector<4x256xf32>
    %cst_6 = arith.constant dense<0.000000e+00> : vector<4xf32>
    %9 = vector.multi_reduction <add>, %8, %cst_6 [1] : vector<4x256xf32> to vector<4xf32>
    %10 = vector.shape_cast %9 : vector<4xf32> to vector<4x1xf32>
    %cst_7 = arith.constant 3.906250e-03 : f32
    %11 = vector.broadcast %cst_7 : f32 to vector<4x1xf32>
    %12 = arith.mulf %10, %11 : vector<4x1xf32>
    %13 = arith.mulf %7, %7 : vector<4x1xf32>
    %14 = arith.subf %12, %13 : vector<4x1xf32>
    %c0_8 = arith.constant 0 : index
    %c0_9 = arith.constant 0 : index
    %15 = vector.load %arg3[%c0_8, %c0_9] : memref<4x1xf32, #tpu.memory_space<vmem>>, vector<4x1xf32>
    %cst_10 = arith.constant 9.99999974E-6 : f32
    %16 = vector.broadcast %cst_10 : f32 to vector<4x1xf32>
    %17 = arith.addf %14, %16 : vector<4x1xf32>
    %18 = math.rsqrt %17 : vector<4x1xf32>
    %19 = arith.mulf %15, %18 : vector<4x1xf32>
    %c0_11 = arith.constant 0 : index
    %c0_12 = arith.constant 0 : index
    %20 = vector.load %arg4[%c0_11, %c0_12] : memref<4x1xf32, #tpu.memory_space<vmem>>, vector<4x1xf32>
    %21 = arith.mulf %7, %19 : vector<4x1xf32>
    %22 = arith.subf %20, %21 : vector<4x1xf32>
    %23 = tpu.iota {dimensions = array<i32: 0>} : vector<4x4xi32>
    %24 = tpu.iota {dimensions = array<i32: 1>} : vector<4x4xi32>
    %25 = arith.cmpi eq, %23, %24 : vector<4x4xi32>
    %26 = arith.extui %25 : vector<4x4xi1> to vector<4x4xi32>
    %27 = arith.sitofp %26 : vector<4x4xi32> to vector<4x4xf32>
    %c0_13 = arith.constant 0 : index
    %c0_14 = arith.constant 0 : index
    %28 = vector.load %arg7[%c0_13, %c0_14] : memref<8x4xf32, #tpu.memory_space<vmem>>, vector<8x4xf32>
    %29 = vector.broadcast %19 : vector<4x1xf32> to vector<4x4xf32>
    %30 = arith.mulf %29, %27 : vector<4x4xf32>
    %cst_15 = arith.constant dense<0.000000e+00> : vector<8x4xf32>
    %31 = tpu.matmul %28, %30, %cst_15 {dimension_numbers = #tpu.dot_dimension_numbers<[1], [0], [0], [1], [0, 0, 1, 1], [], []>} : vector<8x4xf32>, vector<4x4xf32>, vector<8x4xf32> -> vector<8x4xf32>
    %32 = vector.broadcast %22 : vector<4x1xf32> to vector<4x4xf32>
    %33 = arith.mulf %32, %27 : vector<4x4xf32>
    %cst_16 = arith.constant dense<0.000000e+00> : vector<8x4xf32>
    %34 = tpu.matmul %28, %33, %cst_16 {dimension_numbers = #tpu.dot_dimension_numbers<[1], [0], [0], [1], [0, 0, 1, 1], [], []>} : vector<8x4xf32>, vector<4x4xf32>, vector<8x4xf32> -> vector<8x4xf32>
    %cst_17 = arith.constant dense<0.000000e+00> : vector<8xf32>
    %35 = vector.multi_reduction <add>, %34, %cst_17 [1] : vector<8x4xf32> to vector<8xf32>
    %36 = vector.shape_cast %35 : vector<8xf32> to vector<8x1xf32>
    %cst_18 = arith.constant dense<0.000000e+00> : vector<4xf32>
    %37 = vector.multi_reduction <add>, %3, %cst_18 [1] : vector<4x256xf32> to vector<4xf32>
    %38 = vector.shape_cast %37 : vector<4xf32> to vector<4x1xf32>
    %cst_19 = arith.constant 3.906250e-03 : f32
    %39 = vector.broadcast %cst_19 : f32 to vector<4x1xf32>
    %40 = arith.mulf %38, %39 : vector<4x1xf32>
    %41 = arith.mulf %3, %3 : vector<4x256xf32>
    %cst_20 = arith.constant dense<0.000000e+00> : vector<4xf32>
    %42 = vector.multi_reduction <add>, %41, %cst_20 [1] : vector<4x256xf32> to vector<4xf32>
    %43 = vector.shape_cast %42 : vector<4xf32> to vector<4x1xf32>
    %cst_21 = arith.constant 3.906250e-03 : f32
    %44 = vector.broadcast %cst_21 : f32 to vector<4x1xf32>
    %45 = arith.mulf %43, %44 : vector<4x1xf32>
    %46 = arith.mulf %40, %40 : vector<4x1xf32>
    %47 = arith.subf %45, %46 : vector<4x1xf32>
    %c0_22 = arith.constant 0 : index
    %c0_23 = arith.constant 0 : index
    %48 = vector.load %arg5[%c0_22, %c0_23] : memref<4x1xf32, #tpu.memory_space<vmem>>, vector<4x1xf32>
    %cst_24 = arith.constant 9.99999974E-6 : f32
    %49 = vector.broadcast %cst_24 : f32 to vector<4x1xf32>
    %50 = arith.addf %47, %49 : vector<4x1xf32>
    %51 = math.rsqrt %50 : vector<4x1xf32>
    %52 = arith.mulf %48, %51 : vector<4x1xf32>
    %c0_25 = arith.constant 0 : index
    %c0_26 = arith.constant 0 : index
    %53 = vector.load %arg6[%c0_25, %c0_26] : memref<4x1xf32, #tpu.memory_space<vmem>>, vector<4x1xf32>
    %54 = arith.mulf %40, %52 : vector<4x1xf32>
    %55 = arith.subf %53, %54 : vector<4x1xf32>
    %56 = tpu.iota {dimensions = array<i32: 0>} : vector<4x4xi32>
    %57 = tpu.iota {dimensions = array<i32: 1>} : vector<4x4xi32>
    %58 = arith.cmpi eq, %56, %57 : vector<4x4xi32>
    %59 = arith.extui %58 : vector<4x4xi1> to vector<4x4xi32>
    %60 = arith.sitofp %59 : vector<4x4xi32> to vector<4x4xf32>
    %c0_27 = arith.constant 0 : index
    %c0_28 = arith.constant 0 : index
    %61 = vector.load %arg8[%c0_27, %c0_28] : memref<8x4xf32, #tpu.memory_space<vmem>>, vector<8x4xf32>
    %62 = vector.broadcast %52 : vector<4x1xf32> to vector<4x4xf32>
    %63 = arith.mulf %62, %60 : vector<4x4xf32>
    %cst_29 = arith.constant dense<0.000000e+00> : vector<8x4xf32>
    %64 = tpu.matmul %61, %63, %cst_29 {dimension_numbers = #tpu.dot_dimension_numbers<[1], [0], [0], [1], [0, 0, 1, 1], [], []>} : vector<8x4xf32>, vector<4x4xf32>, vector<8x4xf32> -> vector<8x4xf32>
    %65 = vector.broadcast %55 : vector<4x1xf32> to vector<4x4xf32>
    %66 = arith.mulf %65, %60 : vector<4x4xf32>
    %cst_30 = arith.constant dense<0.000000e+00> : vector<8x4xf32>
    %67 = tpu.matmul %61, %66, %cst_30 {dimension_numbers = #tpu.dot_dimension_numbers<[1], [0], [0], [1], [0, 0, 1, 1], [], []>} : vector<8x4xf32>, vector<4x4xf32>, vector<8x4xf32> -> vector<8x4xf32>
    %cst_31 = arith.constant dense<0.000000e+00> : vector<8xf32>
    %68 = vector.multi_reduction <add>, %67, %cst_31 [1] : vector<8x4xf32> to vector<8xf32>
    %69 = vector.shape_cast %68 : vector<8xf32> to vector<8x1xf32>
    %cst_32 = arith.constant dense<0.000000e+00> : vector<8x256xf32>
    %70 = tpu.matmul %31, %1, %cst_32 {dimension_numbers = #tpu.dot_dimension_numbers<[1], [0], [0], [1], [0, 0, 1, 1], [], []>} : vector<8x4xf32>, vector<4x256xf32>, vector<8x256xf32> -> vector<8x256xf32>
    %cst_33 = arith.constant dense<0.000000e+00> : vector<8x256xf32>
    %71 = tpu.matmul %64, %3, %cst_33 {dimension_numbers = #tpu.dot_dimension_numbers<[1], [0], [0], [1], [0, 0, 1, 1], [], []>} : vector<8x4xf32>, vector<4x256xf32>, vector<8x256xf32> -> vector<8x256xf32>
    %72 = arith.addf %70, %71 : vector<8x256xf32>
    %73 = arith.addf %36, %69 : vector<8x1xf32>
    %74 = vector.broadcast %73 : vector<8x1xf32> to vector<8x256xf32>
    %75 = arith.addf %72, %74 : vector<8x256xf32>
    %c0_34 = arith.constant 0 : index
    %c0_35 = arith.constant 0 : index
    %c0_36 = arith.constant 0 : index
    %76 = vector.load %arg9[%c0_34, %c0_35, %c0_36] : memref<1x8x256xf32, #tpu.memory_space<vmem>>, vector<1x8x256xf32>
    %77 = vector.shape_cast %76 : vector<1x8x256xf32> to vector<8x256xf32>
    %78 = vector.shape_cast %75 : vector<8x256xf32> to vector<1x8x256xf32>
    tpu.vector_store %arg9[%c0_34, %c0_35, %c0_36], %78 {strides = array<i32>} : memref<1x8x256xf32, #tpu.memory_space<vmem>>, vector<1x8x256xf32>,
    return
  }
  func.func @transform_0(%arg0: i32) -> (i32, i32, i32) {
    %c0_i32 = arith.constant 0 : i32
    %c0_i32_0 = arith.constant 0 : i32
    %c0_i32_1 = arith.constant 0 : i32
    return %arg0, %c0_i32, %c0_i32_0 : i32, i32, i32
  }
  func.func @transform_1(%arg0: i32) -> (i32, i32, i32) {
    %c0_i32 = arith.constant 0 : i32
    %c0_i32_0 = arith.constant 0 : i32
    %c0_i32_1 = arith.constant 0 : i32
    return %arg0, %c0_i32, %c0_i32_0 : i32, i32, i32
  }
  func.func @transform_2(%arg0: i32) -> (i32, i32) {
    %c0_i32 = arith.constant 0 : i32
    %c0_i32_0 = arith.constant 0 : i32
    %c0_i32_1 = arith.constant 0 : i32
    return %c0_i32, %c0_i32_0 : i32, i32
  }
  func.func @transform_3(%arg0: i32) -> (i32, i32) {
    %c0_i32 = arith.constant 0 : i32
    %c0_i32_0 = arith.constant 0 : i32
    %c0_i32_1 = arith.constant 0 : i32
    return %c0_i32, %c0_i32_0 : i32, i32
  }
  func.func @transform_4(%arg0: i32) -> (i32, i32) {
    %c0_i32 = arith.constant 0 : i32
    %c0_i32_0 = arith.constant 0 : i32
    %c0_i32_1 = arith.constant 0 : i32
    return %c0_i32, %c0_i32_0 : i32, i32
  }
  func.func @transform_5(%arg0: i32) -> (i32, i32) {
    %c0_i32 = arith.constant 0 : i32
    %c0_i32_0 = arith.constant 0 : i32
    %c0_i32_1 = arith.constant 0 : i32
    return %c0_i32, %c0_i32_0 : i32, i32
  }
  func.func @transform_6(%arg0: i32) -> (i32, i32) {
    %c0_i32 = arith.constant 0 : i32
    %c0_i32_0 = arith.constant 0 : i32
    %c0_i32_1 = arith.constant 0 : i32
    return %c0_i32, %c0_i32_0 : i32, i32
  }
  func.func @transform_7(%arg0: i32) -> (i32, i32) {
    %c0_i32 = arith.constant 0 : i32
    %c0_i32_0 = arith.constant 0 : i32
    %c0_i32_1 = arith.constant 0 : i32
    return %c0_i32, %c0_i32_0 : i32, i32
  }
  func.func @transform_8(%arg0: i32) -> (i32, i32, i32) {
    %c0_i32 = arith.constant 0 : i32
    %c0_i32_0 = arith.constant 0 : i32
    %c0_i32_1 = arith.constant 0 : i32
    return %arg0, %c0_i32, %c0_i32_0 : i32, i32, i32
  }
}

</mosaic_0001>

<bundles_post_ra>
// kernel: tpu_custom_call.1
= control target key start
LH: loop header
LB: loop body
LE: loop exit
PB: predicated region body
PF: predicated region fallthrough
CT: control target
= control target key end

     0   :  { %13 = vsyncpa [#allocation3], 0  ;;  %s1075_s0 = inlined_call_operand.vmem [shape: f32[2,4,256], index: 0, kind: input, shape index: {}]   ;;  %s1076_s1 = inlined_call_operand.vmem [shape: f32[2,4,256], index: 1, kind: input, shape index: {}]   ;;  %s1077_s2 = inlined_call_operand.vmem [shape: f32[4,1], index: 2, kind: input, shape index: {}]   ;;  %s1078_s3 = inlined_call_operand.vmem [shape: f32[4,1], index: 3, kind: input, shape index: {}]   ;;  %s1079_s4 = inlined_call_operand.vmem [shape: f32[4,1], index: 4, kind: input, shape index: {}]   ;;  %s1080_s5 = inlined_call_operand.vmem [shape: f32[4,1], index: 5, kind: input, shape index: {}]   ;;  %s1081_s6 = inlined_call_operand.vmem [shape: f32[8,4], index: 6, kind: input, shape index: {}]   ;;  %s1082_s7 = inlined_call_operand.vmem [shape: f32[8,4], index: 7, kind: input, shape index: {}]   ;;  %s1083_s8 = inlined_call_operand.hbm [shape: f32[2,8,256], index: 8, kind: output, shape index: {}]  }
   0x1   :  { %15 = vsyncpa [#allocation3 + $0x1], 0  ;;  %s937_s27 = smov 0   ;;  %s939_s28 = smov 0  }
   0x2   :  { %s941_s29 = smov 0   ;;  %s943_s30 = smov 0  }
   0x3 LB: > { %s958_s9 = sadd.s32 4294967295, %s888_s30   ;;  %s744_s10 = sadd.s32 4294967294, %s888_s30   ;;  %s888_s30 = sphi %s943_s30, %s1089_s30   ;;  %s884_s29 = sphi %s941_s29, %s1088_s29   ;;  %s880_s28 = sphi %s939_s28, %s1087_s28   ;;  %s876_s27 = sphi %s937_s27, %s1086_s27  }
   0x4   : > { %s962_s11 = sadd.s32 1, %s888_s30   ;;  %s206_s12 = sadd.s32 1, %s884_s29 }
   0x5   : > { %s203_s13 = ssub.s32 %s888_s30, %s962_s11  ;;  %p216_p0 = scmp.ne.s32.totalorder %s884_s29, %s880_s28 }
   0x6   : > { %p204_p1 = scmp.eq.s32.totalorder %s203_s13, 0  ;;  %p217_p2 = scmp.eq.s32.totalorder %s958_s9, 1 }
   0x7   : > { %p222_p3 = scmp.ne.s32.totalorder %s880_s28, %s876_s27  ;;  %p223_p4 = scmp.eq.s32.totalorder %s744_s10, 1 }
   0x8   : > { %s973_s14 = scalar_select %p204_p1, %s884_s29, %s206_s12  }
   0x9   : > { %p975_p5 = por %p217_p2, %p216_p0  ;;  %p979_p6 = por %p223_p4, %p222_p3 }
   0xa   : > { %p747_p7 = scmp.ge.s32.totalorder %s888_s30, 1  ;;  %p275_p8 = scmp.lt.s32.totalorder %s888_s30, 3 }
   0xc   : > { %p276_p9 = pnand %p747_p7, %p275_p8 }
   0xd   : > { %p314_p10 = scmp.lt.s32.totalorder (!%p276_p9), %s958_s9, 1  ;;  %s777_s26 = sshll.u32 (!%p276_p9), %s958_s9, 4 }
   0xe   : > { %279 = sbr.rel (%p276_p9) target bundleno = 580 (0x244), region = 52  ;;  %s668_s13 = scalar_lea.hbm (!%p276_p9), %s1083_s8, %s777_s26 }
   0xf   : > { %s672_s19 = sshll.u32 (!%p276_p9), %s668_s13, 4  ;;  %s673_s19 = int_to_ptr.hbm [resolvable:$true] %s672_s19 }
  0x10   : > { %s840_s20 = sshra.s32 (!%p276_p9), %s673_s19, 4  ;;  %s841_s20 = int_to_ptr.hbm [resolvable:$true] %s840_s20 }
  0x11   : > { %p847_p0 = scmp.lt.s32.totalorder (!%p276_p9), %s841_s20, %s1083_s8 }
  0x13   : > { %s315_s17 = scalar_select %p314_p10, %s958_s9, 1  ;;  %vm332_vm0 = vcmask 1043456   ;;  %v890_v27 = vmov 0   ;;  %v354_v46 = vld [vmem:[%s1077_s2] sm:$0xf]  ;;  %vm384_vm8 = vcmask 31744  }
  0x14   : > { %819 = vset.pattern.permute.xlu2 %v890_v27  ;;  %821 = vset.pattern.permute.xlu1 %v890_v27  ;;  %v367_v50 = vld [vmem:[%s1078_s3] sm:$0xf] }
  0x15   : > { %s775_s18 = sshll.u32 %s315_s17, 3  ;;  %820 = vset.pattern.permute.xlu0 %v890_v27  ;;  %v470_v58 = vld [vmem:[%s1079_s4] sm:$0xf] }
  0x16   : > { %s318_s21 = scalar_lea.vmem %s1075_s0, %s775_s18  ;;  %s323_s24 = scalar_lea.vmem %s1076_s1, %s775_s18  ;;  %v483_v62 = vld [vmem:[%s1080_s5] sm:$0xf] }
  0x17   : > { %v324_v0 = vld [vmem:[%s318_s21] sm:$0xff]  ;;  %s842_s21 = scalar_lea.hbm %s841_s20, 16 }
  0x18   : > { %327 = vst [vmem:[#allocation1] ss:$2 sm:$0xff] %v324_v0  ;;  %v339_v1 = vmul.f32 %v324_v0, %v324_v0  ;;  %v325_v7 = vld [vmem:[%s323_s24] sm:$0xff]  ;;  %s311_s24 = sand.u32 1, %s880_s28   ;;  %p843_p11 = scmp.ne.s32.totalorder %s841_s20, %s842_s21 }
  0x19   : > { %v455_v13 = vmul.f32 %v325_v7, %v325_v7  ;;  %s748_s25 = sshll.u32 %s311_s24, 4  ;;  %s657_s9 = scalar_lea.sflag [#allocation3], %s311_s24 }
  0x1a   : > { %s313_s17 = scalar_lea.vmem [#allocation2], %s748_s25  ;;  %p844_p12 = pnand %p843_p11, %p975_p5 }
  0x1b   : > { %s670_s18 = sshll.u32 %s313_s17, 4  ;;  %s846_s25 = scalar_lea.hbm %s1083_s8, 32  ;;  %s671_s18 = int_to_ptr.vmem [resolvable:$true] %s670_s18 }
  0x1c   : > { %p845_p13 = pneg %p844_p12  ;;  %p848_p1 = scmp.lt.s32.totalorder %s846_s25, %s842_s21 }
  0x1e   : > { %p849_p2 = por %p848_p1, %p847_p0 }
  0x1f   : > { %v328_v2 = vld.sshfl [vmem:[#allocation1] sm:$0xff pattern:$0x75316420]  ;;  %v329_v3 = vld.sshfl [vmem:[#allocation1 + $0x8] sm:$0xff pattern:$0x75316420] }
  0x20   : > { %v333_v4 = vsel %vm332_vm0, %v328_v2, 0.0  ;;  %v334_v5 = vsel %vm332_vm0, %v329_v3, 0.0  ;;  %341 = vst [vmem:[#allocation1] ss:$2 sm:$0xff] %v339_v1  ;;  %v370_v1 = vlaneseq  ;;  %p850_p3 = pnand %p849_p2, %p845_p13 }
  0x21   : > { %v335_v6 = vadd.f32 %v334_v5, %v333_v4  ;;  %v891_v4 = vmov 0.0  }
  0x22   : > { %v371_v2 = vshrl.u32 %v370_v1, 7  ;;  %v373_v3 = vand.u32 127, %v370_v1 }
  0x23   : > { %336 = vadd.xlane.f32.xlu0 %v335_v6 }
  0x24   : > { %vm374_vm7 = vcmp.eq.s32.totalorder %v371_v2, %v373_v3 }
  0x25   : > { %v753_v5 = vsel %vm374_vm7, 1.0, %v891_v4 }
  0x27   : > { %v342_v8 = vld.sshfl [vmem:[#allocation1] sm:$0xff pattern:$0x75316420]  ;;  %v343_v9 = vld.sshfl [vmem:[#allocation1 + $0x8] sm:$0xff pattern:$0x75316420] }
  0x28   : > { %v346_v10 = vsel %vm332_vm0, %v342_v8, 0.0  ;;  %v347_v11 = vsel %vm332_vm0, %v343_v9, 0.0  ;;  %444 = vst [vmem:[#allocation1] ss:$2 sm:$0xff] %v325_v7  ;;  %v377_v8 = vld [vmem:[%s1081_s6] sm:$0xff] }
  0x29   : > { %v348_v12 = vadd.f32 %v347_v11, %v346_v10  ;;  %v486_v11 = vld [vmem:[%s1082_s7] sm:$0xff] }
  0x2b   : > { %349 = vadd.xlane.f32.xlu1 %v348_v12 }
  0x2f   : > { %v445_v14 = vld.sshfl [vmem:[#allocation1] sm:$0xff pattern:$0x75316420]  ;;  %v446_v15 = vld.sshfl [vmem:[#allocation1 + $0x8] sm:$0xff pattern:$0x75316420] }
  0x30   : > { %v449_v16 = vsel %vm332_vm0, %v445_v14, 0.0  ;;  %v450_v17 = vsel %vm332_vm0, %v446_v15, 0.0  ;;  %457 = vst [vmem:[#allocation1] ss:$2 sm:$0xff] %v455_v13 }
  0x31   : > { %v451_v18 = vadd.f32 %v450_v17, %v449_v16 }
  0x33   : > { %452 = vadd.xlane.f32.xlu0 %v451_v18 }
  0x37   : > { %v458_v19 = vld.sshfl [vmem:[#allocation1] sm:$0xff pattern:$0x75316420]  ;;  %v459_v20 = vld.sshfl [vmem:[#allocation1 + $0x8] sm:$0xff pattern:$0x75316420] }
  0x38   : > { %v462_v21 = vsel %vm332_vm0, %v458_v19, 0.0  ;;  %v463_v22 = vsel %vm332_vm0, %v459_v20, 0.0  ;;  %551 = vst [vmem:[#allocation1] ss:$2 sm:$0xff] %v325_v7 }
  0x39   : > { %v464_v23 = vadd.f32 %v463_v22, %v462_v21 }
  0x3b   : > { %465 = vadd.xlane.f32.xlu1 %v464_v23 }
  0x3f   : > { %v1001_v24 = vld.sshfl [vmem:[#allocation1] sm:$0xff pattern:$0x75316420]  ;;  %v1003_v25 = vld.sshfl [vmem:[#allocation1 + $0x8] sm:$0xff pattern:$0x75316420] }
  0x40   : > { %601 = vst [vmem:[#allocation1] ss:$2 sm:$0xff] %v324_v0 }
  0x47   : > { %v602_v12 = vld.sshfl [vmem:[#allocation1] sm:$0xff pattern:$0x75316420]  ;;  %v603_v17 = vld.sshfl [vmem:[#allocation1 + $0x8] sm:$0xff pattern:$0x75316420] }
  0x96   : > { %v337_v26 = vpop.xlane.xlu0 %336 }
  0x97   : > { %v338_v28 = vmul.f32 0.00390625, %v337_v26 }
  0x99   : > { %v352_v29 = vmul.f32 %v338_v28, %v338_v28 }
  0x9e   : > { %v350_v30 = vpop.xlane.xlu1 %349 }
  0x9f   : > { %v351_v31 = vmul.f32 0.00390625, %v350_v30 }
  0xa1   : > { %v353_v32 = vsub.f32 %v351_v31, %v352_v29 }
  0xa3   : > { %v355_v33 = vadd.f32 1e-05, %v353_v32 }
  0xa5   : > { %822 = vrsqrt.f32 %v355_v33  ;;  %vm362_vm1 = vweird.f32 %v355_v33 }
  0xa6   : > { %v453_v34 = vpop.xlane.xlu0 %452 }
  0xa7   : > { %v454_v35 = vmul.f32 0.00390625, %v453_v34 }
  0xa9   : > { %v468_v38 = vmul.f32 %v454_v35, %v454_v35 }
  0xab   : > { %v823_v36 = vpop.eup %822 }
  0xac   : > { %v357_v37 = vmul.f32 %v823_v36, %v355_v33  ;;  %vm363_vm2 = vweird.f32 %v823_v36 }
  0xad   : > { %vm364_vm3 = vmor %vm362_vm1, %vm363_vm2 }
  0xae   : > { %v358_v39 = vmul.f32 %v823_v36, %v357_v37  ;;  %v466_v40 = vpop.xlane.xlu1 %465 }
  0xaf   : > { %v467_v41 = vmul.f32 0.00390625, %v466_v40 }
  0xb0   : > { %v359_v42 = vmul.f32 0.5, %v358_v39 }
  0xb1   : > { %v469_v43 = vsub.f32 %v467_v41, %v468_v38 }
  0xb2   : > { %v360_v44 = vsub.f32 1.5, %v359_v42 }
  0xb3   : > { %v471_v45 = vadd.f32 1e-05, %v469_v43 }
  0xb4   : > { %v361_v47 = vmul.f32 %v823_v36, %v360_v44 }
  0xb5   : > { %824 = vrsqrt.f32 %v471_v45  ;;  %vm478_vm5 = vweird.f32 %v471_v45 }
  0xb6   : > { %v365_v48 = vsel %vm364_vm3, %v823_v36, %v361_v47 }
  0xb7   : > { %v366_v49 = vmul.f32 %v365_v48, %v354_v46 }
  0xb9   : > { %380 = vperm.xlu2 %819, %v366_v49   ;;  %v368_v51 = vmul.f32 %v366_v49, %v338_v28 }
  0xbb   : > { %v825_v52 = vpop.eup %824  ;;  %v369_v53 = vsub.f32 %v367_v50, %v368_v51 }
  0xbc   : > { %v473_v54 = vmul.f32 %v825_v52, %v471_v45  ;;  %vm479_vm4 = vweird.f32 %v825_v52 }
  0xbd   : > { %413 = vperm.xlu1 %821, %v369_v53   ;;  %vm480_vm6 = vmor %vm478_vm5, %vm479_vm4 }
  0xbe   : > { %v474_v55 = vmul.f32 %v825_v52, %v473_v54 }
  0xc0   : > { %v475_v56 = vmul.f32 0.5, %v474_v55 }
  0xc2   : > { %v476_v57 = vsub.f32 1.5, %v475_v56 }
  0xc4   : > { %v477_v59 = vmul.f32 %v825_v52, %v476_v57 }
  0xc6   : > { %v481_v60 = vsel %vm480_vm6, %v825_v52, %v477_v59 }
  0xc7   : > { %v482_v61 = vmul.f32 %v481_v60, %v470_v58 }
  0xc9   : > { %489 = vperm.xlu2 %819, %v482_v61   ;;  %v484_v63 = vmul.f32 %v482_v61, %v454_v35 }
  0xcb   : > { %v485_v0 = vsub.f32 %v483_v62, %v484_v63 }
  0xcd   : > { %521 = vperm.xlu0 %820, %v485_v0  }
 0x113   : > { %v381_v6 = vpop.permute.xlu2 %380 }
 0x114   : > { %v383_v7 = vmul.f32 %v753_v5, %v381_v6 }
 0x116   : > { %754 = vmatpush.msk.msra.mxu0 %vm332_vm0, %v383_v7 }
 0x117   : > { %755 = vmatmul.msk.f32.vlgmr.msra.gmra.mxu0 %vm384_vm8, %v377_v8 }
 0x118   : > { %762 = vmatpush.msk.msrb.mxu0 %vm332_vm0, %v1001_v24 }
 0x123   : > { %v490_v9 = vpop.permute.xlu2 %489 }
 0x124   : > { %v492_v10 = vmul.f32 %v753_v5, %v490_v9 }
 0x126   : > { %758 = vmatpush.msk.msra.mxu2 %vm332_vm0, %v492_v10 }
 0x127   : > { %759 = vmatmul.msk.f32.vlgmr.msra.gmra.mxu2 %vm384_vm8, %v486_v11 }
 0x128   : > { %766 = vmatpush.msk.msrb.mxu2 %vm332_vm0, %v602_v12 }
 0x12f   : > { %v414_v13 = vpop.permute.xlu1 %413 }
 0x130   : > { %v416_v14 = vmul.f32 %v753_v5, %v414_v13 }
 0x132   : > { %756 = vmatpush.msk.msra.mxu1 %vm332_vm0, %v416_v14 }
 0x133   : > { %757 = vmatmul.msk.f32.vlgmr.msra.gmra.mxu1 %vm384_vm8, %v377_v8 }
 0x134   : > { %764 = vmatpush.msk.msrb.mxu1 %vm332_vm0, %v1003_v25 }
 0x13f   : > { %v522_v15 = vpop.permute.xlu0 %521 }
 0x140   : > { %v524_v16 = vmul.f32 %v753_v5, %v522_v15 }
 0x142   : > { %760 = vmatpush.msk.msra.mxu3 %vm332_vm0, %v524_v16 }
 0x143   : > { %761 = vmatmul.msk.f32.vlgmr.msra.gmra.mxu3 %vm384_vm8, %v486_v11 }
 0x144   : > { %768 = vmatpush.msk.msrb.mxu3 %vm332_vm0, %v603_v17 }
 0x194   : > { %v408_v18 = vpop.f32.mrf.mxu0 }
 0x195   : > { %767 = vmatmul.msk.f32.vlgmr.msrb.gmra.mxu2 %vm384_vm8, %v408_v18  ;;  %769 = vmatmul.msk.f32.vlgmr.msrb.gmra.mxu3 %vm384_vm8, %v408_v18 }
 0x1aa   : > { %v516_v19 = vpop.f32.mrf.mxu2 }
 0x1ab   : > { %763 = vmatmul.msk.f32.vlgmr.msrb.gmra.mxu0 %vm384_vm8, %v516_v19  ;;  %765 = vmatmul.msk.f32.vlgmr.msrb.gmra.mxu1 %vm384_vm8, %v516_v19 }
 0x1b0   : > { %v437_v20 = vpop.f32.mrf.mxu1 }
 0x1b1   : > { %v440_v21 = vsel %vm384_vm8, %v437_v20, 0.0 }
 0x1b2   : > { %441 = vadd.xlane.f32.xlu2 %v440_v21 }
 0x1c6   : > { %v545_v22 = vpop.f32.mrf.mxu3 }
 0x1c7   : > { %v548_v23 = vsel %vm384_vm8, %v545_v22, 0.0 }
 0x1c8   : > { %549 = vadd.xlane.f32.xlu1 %v548_v23 }
 0x218   : > { %v628_v24 = vpop.f32.mrf.mxu2  ;;  %v648_v25 = vpop.f32.mrf.mxu3 }
 0x225   : > { %v442_v28 = vpop.xlane.xlu2 %441 }
 0x228   : > { %v578_v26 = vpop.f32.mrf.mxu0  ;;  %v598_v27 = vpop.f32.mrf.mxu1 }
 0x229   : > { %v629_v29 = vadd.f32 %v628_v24, %v578_v26  ;;  %v649_v30 = vadd.f32 %v648_v25, %v598_v27 }
 0x23b   : > { %v550_v31 = vpop.xlane.xlu1 %549 }
 0x23c   : > { %v651_v32 = vadd.f32 %v550_v31, %v442_v28 }
 0x23e   : > { %v652_v33 = vadd.f32 %v651_v32, %v629_v29  ;;  %v653_v34 = vadd.f32 %v651_v32, %v649_v30 }
 0x240   : > { %654 = vst [vmem:[%s313_s17] sm:$0xff] %v652_v33 }
 0x241   : > { %655 = vst [vmem:[%s313_s17 + $0x8] sm:$0xff] %v653_v34 }
 0x242   : > { %853 = shalt.err (!%p850_p3)
}
 0x243   : > { %778 = dma.vmem_to_hbm [thread:$0]  (%p975_p5), %s671_s18, 256, %s673_s19, %s657_s9  }
 0x244 PF: > { %p784_p4 = scmp.ge.s32.totalorder %s888_s30, 2  ;;  %s684_s24 = sand.u32 1, %s876_s27  }
 0x245   : > { %s685_s12 = scalar_lea.sflag [#allocation3], %s684_s24 }
 0x246   : > { %p781_p7 = pnand %p784_p4, %p979_p6 }
 0x248   : > { %p782_p8 = pneg %p781_p7 }
 0x24a   : > { %871 = dma.done.wait (%p782_p8), %s685_s12, 256  }
 0x24b   : > { %873 = vsyncadd (%p782_p8), %s685_s12, 4294967040  ;;  %p18_p9 = scmp.ge.s32.totalorder %s962_s11, 4   ;;  %s1086_s27 = smov %s880_s28 }
 0x24c   : > { %s1087_s28 = smov %s884_s29  ;;  %s1088_s29 = smov %s973_s14 }
 0x24d   : > { %s1089_s30 = smov %s962_s11  ;;  %20 = sbr.rel (!%p18_p9) target bundleno = 3 (0x3), region = 90 }
 0x252   :  { %691 = vsyncpa [#allocation3], 1 }
 0x253   :  { %693 = vsyncpa [#allocation3 + $0x1], 1 }

</bundles_post_ra>
